<compile_context>
chip_gen: v7x
topology: tpu7x:2x2x1
jax: 0.10.0
libtpu: 0.0.40
codegen_flags: <defaults>
</compile_context>

<pallas_src>
import functools
import math

import jax
import jax.numpy as jnp
from jax import lax
from jax.experimental import pallas as pl
from jax.experimental.pallas import tpu as pltpu


def _lora_kernel(x_ref, a_ref, b_ref, o_ref, acc_ref, *,
                 scale, num_k, compute_dtype):
    # x_ref:   (tm, tk)              streamed input tile (native dtype)
    # a_ref:   (num_k, rank, tk)     full lora_A, VMEM-resident (constant index)
    # b_ref:   (out_features, rank)  full lora_B, VMEM-resident (constant index)
    # o_ref:   (tm, out_features)    output tile (full N width, lane dense)
    # acc_ref: (tm, rank) f32        carries x @ A^T across the K grid axis
    k = pl.program_id(1)

    @pl.when(k == 0)
    def _():
        acc_ref[...] = jnp.zeros_like(acc_ref)

    x = x_ref[...]
    a = a_ref[k]                      # (rank, tk) K-window of the resident A
    if compute_dtype is not None:
        x = x.astype(compute_dtype)
        a = a.astype(compute_dtype)

    # x @ A^T contribution of this K tile: contract x's in_features (dim 1)
    # against A's in_features (dim 1); f32 accumulation on the MXU.
    acc_ref[...] += lax.dot_general(
        x, a,
        dimension_numbers=(((1,), (1,)), ((), ())),
        preferred_element_type=jnp.float32,
    )

    @pl.when(k == num_k - 1)
    def _():
        # Fold the scale into the tiny (tm, rank) intermediate and keep it in
        # f32 (no intermediate quantization).  Second MXU pass:
        # (tm, rank) @ (out_features, rank)^T -> (tm, out_features).
        xa = acc_ref[...] * scale
        y = lax.dot_general(
            xa, b_ref[...].astype(jnp.float32),
            dimension_numbers=(((1,), (1,)), ((), ())),
            preferred_element_type=jnp.float32,
        )
        o_ref[...] = y.astype(o_ref.dtype)


def _round_up(n, m):
    return ((n + m - 1) // m) * m


def _choose_tile(dim, max_tile, align):
    """Largest tile <= max_tile that is a multiple of `align` and divides
    `dim`; falls back to the full dim (always a legal Pallas block)."""
    if dim <= max_tile:
        return dim
    t = (max_tile // align) * align
    while t >= align:
        if dim % t == 0:
            return t
        t -= align
    return dim


def lora_forward(x, lora_A, lora_B, scale, *,
                 tm=None, tk=None, compute_dtype=None):
    """y = x @ lora_A.T @ lora_B.T * scale via a single Pallas TPU kernel.

    `scale` (= alpha/rank, fixed at module construction in the PyTorch
    reference) is baked in as a static Python float.  If `compute_dtype` is
    given (e.g. jnp.bfloat16), the first matmul's operands are cast per-tile
    inside the kernel; inputs are never pre-cast/padded in the wrapper.
    """
    M, in_features = x.shape
    rank, in_features_a = lora_A.shape
    out_features, rank_b = lora_B.shape
    assert in_features == in_features_a and rank == rank_b

    out_dtype = x.dtype

    # --- K tile (in_features): bound the streamed x block. 256-lane
    # multiples keep the loads unmasked; full dim when small / indivisible.
    if tk is None:
        tk = _choose_tile(in_features, 2048, 256)
    assert in_features % tk == 0
    num_k = in_features // tk

    # --- M tile: large steps (>= 1-2 MiB of x per grid step) amortise the
    # fixed grid-step overhead; pl.cdiv grid + masked OOB handles the tail,
    # so no wrapper-side padding of x is needed.
    if tm is None:
        tm = min(512, _round_up(M, 8))
    tm = max(8, _round_up(int(tm), 8))
    # v7x megacore: make sure the "parallel" m axis has >= 2 blocks when the
    # batch allows it, so both TensorCores get work.
    if pl.cdiv(M, tm) < 2 and M > 8:
        tm = max(8, _round_up((M + 1) // 2, 8))

    # --- VMEM budget (v7x: 64 MiB physical / 32 MiB default scoped).
    x_b = jnp.dtype(x.dtype).itemsize
    a_b = jnp.dtype(lora_A.dtype).itemsize
    b_b = jnp.dtype(lora_B.dtype).itemsize
    o_b = jnp.dtype(out_dtype).itemsize

    def _vmem_est(tm_):
        # padded (sublane, lane) footprints, default double buffering
        x_buf = 2 * _round_up(tm_, 8) * _round_up(tk, 128) * x_b
        a_buf = 2 * num_k * _round_up(rank, 8) * _round_up(tk, 128) * a_b
        b_buf = 2 * _round_up(out_features, 8) * _round_up(rank, 128) * b_b
        o_buf = 2 * _round_up(tm_, 8) * _round_up(out_features, 128) * o_b
        acc = _round_up(tm_, 8) * _round_up(rank, 128) * 4
        return x_buf + a_buf + b_buf + o_buf + acc

    budget = 24 * 1024 * 1024
    while tm > 8 and _vmem_est(tm) > budget:
        tm = max(8, _round_up(tm // 2, 8))
    # limit ~2x actual use, never close to v7x's 64 MiB physical for typical
    # LoRA sizes.
    vmem_limit = int(min(max(32 * 1024 * 1024, _vmem_est(tm) + 8 * 1024 * 1024),
                         100 * 1024 * 1024))

    num_m = pl.cdiv(M, tm)

    # lora_A laid out so the current K window is a leading-axis index inside
    # the kernel: a3[k] == lora_A[:, k*tk:(k+1)*tk].  A is tiny (rank x in),
    # so this one-time transform is negligible next to the x stream.
    a3 = lora_A.reshape(rank, num_k, tk).transpose(1, 0, 2)

    kernel = functools.partial(_lora_kernel, scale=float(scale),
                               num_k=num_k, compute_dtype=compute_dtype)

    return pl.pallas_call(
        kernel,
        out_shape=jax.ShapeDtypeStruct((M, out_features), out_dtype),
        grid_spec=pltpu.PrefetchScalarGridSpec(
            num_scalar_prefetch=0,
            grid=(num_m, num_k),
            in_specs=[
                # x: streamed exactly once (block index ignores nothing it needs)
                pl.BlockSpec((tm, tk), lambda m, k: (m, k)),
                # lora_A: fully resident, fetched once (constant block index)
                pl.BlockSpec((num_k, rank, tk), lambda m, k: (0, 0, 0)),
                # lora_B: fully resident, fetched once (constant block index)
                pl.BlockSpec((out_features, rank), lambda m, k: (0, 0)),
            ],
            out_specs=pl.BlockSpec((tm, out_features), lambda m, k: (m, 0)),
            scratch_shapes=[pltpu.VMEM((tm, rank), jnp.float32)],
        ),
        compiler_params=pltpu.CompilerParams(
            dimension_semantics=("parallel", "arbitrary"),
            vmem_limit_bytes=vmem_limit,
        ),
    )(x, a3, lora_B)


def init_lora_params(key, in_features, out_features, rank, dtype=jnp.float32):
    """Match nn.init.kaiming_uniform_(a=sqrt(5)) for lora_A, zeros for lora_B."""
    # kaiming_uniform with a=sqrt(5), fan_in=in_features:
    #   gain  = sqrt(2 / (1 + a^2)) = sqrt(1/3)
    #   bound = gain * sqrt(3 / fan_in) = 1 / sqrt(fan_in)
    bound = 1.0 / math.sqrt(in_features)
    lora_A = jax.random.uniform(
        key, (rank, in_features), dtype=dtype, minval=-bound, maxval=bound
    )
    lora_B = jnp.zeros((out_features, rank), dtype=dtype)
    return lora_A, lora_B


def _reference(x, lora_A, lora_B, scale):
    xa = jnp.dot(x, lora_A.T, precision=jax.lax.Precision.HIGHEST)
    return jnp.dot(xa, lora_B.T, precision=jax.lax.Precision.HIGHEST) * scale


if __name__ == "__main__":
    key = jax.random.PRNGKey(0)
    k_x, k_a, k_b, k_x2, k_a2, k_b2 = jax.random.split(key, 6)

    # --- case 1: module-spec shapes -------------------------------------
    batch, in_features, out_features, rank, alpha = 8, 32, 32, 4, 1
    scale = alpha / rank

    x = jax.random.normal(k_x, (batch, in_features), dtype=jnp.float32)
    # Module init (kaiming_uniform A, zeros B) -- but use a non-zero B for a
    # non-trivial numerical check (a fresh LoRA outputs all zeros).
    lora_A, _ = init_lora_params(k_a, in_features, out_features, rank)
    lora_B = jax.random.uniform(
        k_b, (out_features, rank), dtype=jnp.float32, minval=-0.5, maxval=0.5
    )

    y_ref = _reference(x, lora_A, lora_B, scale)
    y = jax.block_until_ready(lora_forward(x, lora_A, lora_B, scale))
    assert y.shape == (batch, out_features)
    assert jnp.allclose(y, y_ref, atol=1e-4, rtol=1e-4), float(
        jnp.max(jnp.abs(y - y_ref)))

    # bf16 compute path (per-tile cast inside the kernel): loose tolerance.
    y_bf = jax.block_until_ready(
        lora_forward(x, lora_A, lora_B, scale, compute_dtype=jnp.bfloat16))
    assert jnp.allclose(y_bf, y_ref, atol=2e-2, rtol=2e-2)

    # --- case 2: multi-K-tile + ragged batch -----------------------------
    # Forces num_k > 1 (exercises the resident-A dynamic K-window and the
    # K accumulation) and a batch that is not a multiple of 8 (exercises the
    # masked tail m-block -- no wrapper-side padding).
    batch2, in2, out2, rank2 = 37, 256, 96, 8
    x2 = jax.random.normal(k_x2, (batch2, in2), dtype=jnp.float32)
    lora_A2, _ = init_lora_params(k_a2, in2, out2, rank2)
    lora_B2 = jax.random.uniform(
        k_b2, (out2, rank2), dtype=jnp.float32, minval=-0.5, maxval=0.5
    )
    y2_ref = _reference(x2, lora_A2, lora_B2, 2.0 / rank2)
    y2 = jax.block_until_ready(
        lora_forward(x2, lora_A2, lora_B2, 2.0 / rank2, tk=128))
    assert y2.shape == (batch2, out2)
    assert jnp.allclose(y2, y2_ref, atol=1e-4, rtol=1e-4), float(
        jnp.max(jnp.abs(y2 - y2_ref)))

    print("KERNEL_OK")
</pallas_src>

<mosaic_0001>
module attributes {stable_mosaic.version = 11 : i64} {
  func.func @_lora_kernel(%arg0: i32, %arg1: i32, %arg2: memref<8x32xf32, #tpu.memory_space<vmem>>, %arg3: memref<1x4x32xf32, #tpu.memory_space<vmem>>, %arg4: memref<32x4xf32, #tpu.memory_space<vmem>>, %arg5: memref<8x32xf32, #tpu.memory_space<vmem>>, %arg6: memref<8x4xf32, #tpu.memory_space<vmem>>) attributes {dimension_semantics = [#tpu.dimension_semantics<parallel>, #tpu.dimension_semantics<arbitrary>], iteration_bounds = array<i64: 1, 1>, scalar_prefetch = 0 : i64, scratch_operands = 1 : i64, tpu.core_type = #tpu.core_type<tc>, window_params = [{transform_indices = @transform_0, window_bounds = array<i64: 8, 32>}, {pipeline_mode = #tpu.pipeline_mode<synchronous>, transform_indices = @transform_1, window_bounds = array<i64: 1, 4, 32>}, {pipeline_mode = #tpu.pipeline_mode<synchronous>, transform_indices = @transform_2, window_bounds = array<i64: 32, 4>}, {transform_indices = @transform_3, window_bounds = array<i64: 8, 32>}]} {
    %c0_i32 = arith.constant 0 : i32
    %0 = arith.cmpi eq, %arg1, %c0_i32 : i32
    %1 = arith.extui %0 : i1 to i32
    %c0_i32_0 = arith.constant 0 : i32
    %2 = arith.cmpi ne, %1, %c0_i32_0 : i32
    scf.if %2 {
      %cst_10 = arith.constant 0.000000e+00 : f32
      %14 = vector.broadcast %cst_10 : f32 to vector<8x4xf32>
      %c0_11 = arith.constant 0 : index
      %c0_12 = arith.constant 0 : index
      %15 = vector.load %arg6[%c0_11, %c0_12] : memref<8x4xf32, #tpu.memory_space<vmem>>, vector<8x4xf32>
      tpu.vector_store %arg6[%c0_11, %c0_12], %14 {strides = array<i32>} : memref<8x4xf32, #tpu.memory_space<vmem>>, vector<8x4xf32>,
    } else {
    }
    %c0 = arith.constant 0 : index
    %c0_1 = arith.constant 0 : index
    %3 = vector.load %arg2[%c0, %c0_1] : memref<8x32xf32, #tpu.memory_space<vmem>>, vector<8x32xf32>
    %4 = arith.index_cast %arg1 : i32 to index
    %c0_2 = arith.constant 0 : index
    %c0_3 = arith.constant 0 : index
    %5 = vector.load %arg3[%4, %c0_2, %c0_3] : memref<1x4x32xf32, #tpu.memory_space<vmem>>, vector<1x4x32xf32>
    %6 = vector.shape_cast %5 : vector<1x4x32xf32> to vector<4x32xf32>
    %c0_4 = arith.constant 0 : index
    %c0_5 = arith.constant 0 : index
    %7 = vector.load %arg6[%c0_4, %c0_5] : memref<8x4xf32, #tpu.memory_space<vmem>>, vector<8x4xf32>
    %cst = arith.constant dense<0.000000e+00> : vector<8x4xf32>
    %8 = tpu.matmul %3, %6, %cst {dimension_numbers = #tpu.dot_dimension_numbers<[1], [1], [0], [0], [0, 0, 1, 0], [], []>} : vector<8x32xf32>, vector<4x32xf32>, vector<8x4xf32> -> vector<8x4xf32>
    %9 = arith.addf %7, %8 : vector<8x4xf32>
    %c0_6 = arith.constant 0 : index
    %c0_7 = arith.constant 0 : index
    %10 = vector.load %arg6[%c0_6, %c0_7] : memref<8x4xf32, #tpu.memory_space<vmem>>, vector<8x4xf32>
    tpu.vector_store %arg6[%c0_6, %c0_7], %9 {strides = array<i32>} : memref<8x4xf32, #tpu.memory_space<vmem>>, vector<8x4xf32>,
    %c0_i32_8 = arith.constant 0 : i32
    %11 = arith.cmpi eq, %arg1, %c0_i32_8 : i32
    %12 = arith.extui %11 : i1 to i32
    %c0_i32_9 = arith.constant 0 : i32
    %13 = arith.cmpi ne, %12, %c0_i32_9 : i32
    scf.if %13 {
      %c0_10 = arith.constant 0 : index
      %c0_11 = arith.constant 0 : index
      %14 = vector.load %arg6[%c0_10, %c0_11] : memref<8x4xf32, #tpu.memory_space<vmem>>, vector<8x4xf32>
      %cst_12 = arith.constant 2.500000e-01 : f32
      %15 = vector.broadcast %cst_12 : f32 to vector<8x4xf32>
      %16 = arith.mulf %14, %15 : vector<8x4xf32>
      %c0_13 = arith.constant 0 : index
      %c0_14 = arith.constant 0 : index
      %17 = vector.load %arg4[%c0_13, %c0_14] : memref<32x4xf32, #tpu.memory_space<vmem>>, vector<32x4xf32>
      %cst_15 = arith.constant dense<0.000000e+00> : vector<8x32xf32>
      %18 = tpu.matmul %16, %17, %cst_15 {dimension_numbers = #tpu.dot_dimension_numbers<[1], [1], [0], [0], [0, 0, 1, 0], [], []>} : vector<8x4xf32>, vector<32x4xf32>, vector<8x32xf32> -> vector<8x32xf32>
      %c0_16 = arith.constant 0 : index
      %c0_17 = arith.constant 0 : index
      %19 = vector.load %arg5[%c0_16, %c0_17] : memref<8x32xf32, #tpu.memory_space<vmem>>, vector<8x32xf32>
      tpu.vector_store %arg5[%c0_16, %c0_17], %18 {strides = array<i32>} : memref<8x32xf32, #tpu.memory_space<vmem>>, vector<8x32xf32>,
    } else {
    }
    return
  }
  func.func @transform_0(%arg0: i32, %arg1: i32) -> (i32, i32) {
    %c0_i32 = arith.constant 0 : i32
    return %arg0, %arg1 : i32, i32
  }
  func.func @transform_1(%arg0: i32, %arg1: i32) -> (i32, i32, i32) {
    %c0_i32 = arith.constant 0 : i32
    %c0_i32_0 = arith.constant 0 : i32
    %c0_i32_1 = arith.constant 0 : i32
    %c0_i32_2 = arith.constant 0 : i32
    return %c0_i32, %c0_i32_0, %c0_i32_1 : i32, i32, i32
  }
  func.func @transform_2(%arg0: i32, %arg1: i32) -> (i32, i32) {
    %c0_i32 = arith.constant 0 : i32
    %c0_i32_0 = arith.constant 0 : i32
    %c0_i32_1 = arith.constant 0 : i32
    return %c0_i32, %c0_i32_0 : i32, i32
  }
  func.func @transform_3(%arg0: i32, %arg1: i32) -> (i32, i32) {
    %c0_i32 = arith.constant 0 : i32
    %c0_i32_0 = arith.constant 0 : i32
    return %arg0, %c0_i32 : i32, i32
  }
}

</mosaic_0001>

<bundles_post_ra>
// kernel: tpu_custom_call.1
= control target key start
LH: loop header
LB: loop body
LE: loop exit
PB: predicated region body
PF: predicated region fallthrough
CT: control target
= control target key end

     0   :  { %vm26_vm0 = vcmask 261120   ;;  %v281_v1 = vmov 0.0   ;;  %vm282_vm1 = vmmov 0   ;;  %vm19_vm2 = vcmask 31744   ;;  %s343_s0 = inlined_call_operand.vmem [shape: f32[8,32], index: 0, kind: input, shape index: {}]   ;;  %s344_s1 = inlined_call_operand.vmem [shape: f32[1,4,32], index: 1, kind: input, shape index: {}]   ;;  %s345_s2 = inlined_call_operand.vmem [shape: f32[32,4], index: 2, kind: input, shape index: {}]   ;;  %s346_s3 = inlined_call_operand.hbm [shape: f32[8,32], index: 3, kind: output, shape index: {}]  }
   0x1   :  { %v24_v0 = vld [vmem:[%s344_s1] sm:$0xf]  ;;  %229 = vmatprep.subr.mxu0 %v281_v1  ;;  %231 = vmatprep.mubr.msk.f32.mxu0 %vm282_vm1, %v281_v1  ;;  %v112_v3 = vld [vmem:[%s345_s2 + $0x8] sm:$0xff] }
   0x2   :  { %v111_v2 = vld [vmem:[%s345_s2] sm:$0xff] }
   0x3   :  { %8 = vsyncpa [#allocation4], 0  ;;  %230 = vmatpush3.xpose.msk.msra.mxu0 %vm26_vm0, %v24_v0  ;;  %v21_v4 = vld [vmem:[%s343_s0] sm:$0xff]  ;;  %v283_v5 = vmov 0.0|0.0   ;;  %v246_v6 = vpack.c.bf16 %v112_v3, %v111_v2  ;;  %20 = vst.msk [vmem:[#allocation2] sm:$0xff] %vm19_vm2, %v281_v1  ;;  %242 = vmatprep.mubr.msk.f32.mxu1 %vm282_vm1, %v281_v1  ;;  %v113_v7 = vld [vmem:[%s345_s2 + $0x10] sm:$0xff] }
   0x4   :  { %245 = vmatprep.subr.bf16.mxu1 %v283_v5  ;;  %vm247_vm3 = vmpackc.low %vm19_vm2, %vm19_vm2  ;;  %v114_v8 = vld [vmem:[%s345_s2 + $0x18] sm:$0xff]  ;;  %s284_s0 = smov [#allocation3]  }
   0x5   :  { %248 = vmatpush3.bf16.xpose.msk.msra.mxu1 %vm247_vm3, %v246_v6  ;;  %v250_v9 = vpack.c.bf16 %v114_v8, %v113_v7  ;;  %s207_s23 = sshll.u32 %s284_s0, 4  ;;  %s208_s23 = int_to_ptr.vmem [resolvable:$true] %s207_s23 }
   0x6   :  { %232 = vmatmul.mubr.msk.f32.vlgmr.msra.gmra.mrb[0].mxu0 %vm26_vm0, %v21_v4  ;;  %249 = vmatprep.subr.bf16.mxu1 %v283_v5  ;;  %s257_s2 = scalar_lea.vmem %s208_s23, 128  ;;  %p262_p1 = scmp.lt.s32.totalorder %s208_s23, %s208_s23 }
   0x7   :  { %p258_p0 = scmp.ne.s32.totalorder %s208_s23, %s257_s2  ;;  %p263_p2 = scmp.lt.s32.totalorder %s257_s2, %s257_s2 }
   0x9   :  { %p264_p3 = por %p263_p2, %p262_p1 }
   0xa   :  { %v25_v10 = vld [vmem:[#allocation2] sm:$0xff] }
   0xb   :  { %p265_p4 = pnand %p264_p3, %p258_p0 }
   0xd   :  { %252 = vmatpush3.bf16.xpose.msk.msra.mxu1 %vm247_vm3, %v250_v9 }
  0xd9   :  { %v99_v11 = vpop.f32.mrb[0].mxu0 }
  0xda   :  { %v103_v12 = vadd.f32 %v99_v11, %v25_v10  ;;  %v233_v13 = vpop.f32.mrb[1].mxu0 }
  0xdc   :  { %105 = vst.msk [vmem:[#allocation2] sm:$0xff] %vm19_vm2, %v103_v12 }
  0xe3   :  { %v109_v14 = vld [vmem:[#allocation2] sm:$0xff] }
  0xe4   :  { %v110_v15 = vmul.f32 0.25, %v109_v14 }
  0xe6   :  { %243 = vmatmul.mubr.msk.f32.vlgmr.msra.gmra.mrb[0].mxu1 %vm19_vm2, %v110_v15 }
 0x1b9   :  { %v196_v16 = vpop.f32.mrb[0].mxu1 }
 0x1ba   :  { %200 = vst.msk [vmem:[#allocation3] sm:$0xff] %vm26_vm0, %v196_v16  ;;  %v244_v17 = vpop.f32.mrb[1].mxu1 }
 0x1bb   :  { %268 = shalt.err (!%p265_p4)
}
 0x1bc   :  { %s269_s26 = scalar_lea.hbm %s346_s3, 128 }
 0x1bd   :  { %p270_p5 = scmp.ne.s32.totalorder %s346_s3, %s269_s26  ;;  %p273_p6 = scmp.lt.u32.totalorder %s269_s26, %s346_s3 }
 0x1bf   :  { %p275_p7 = pnand %p273_p6, %p270_p5 }
 0x1c1   :  { %278 = shalt.err (!%p275_p7)
}
 0x1c2   :  { %210 = dma.vmem_to_hbm [thread:$0]  %s208_s23, 128, %s346_s3, [#allocation4]  }
 0x1c3   :  { %279 = dma.done.wait [#allocation4], 128  }
 0x1c4   :  { %280 = vsyncadd [#allocation4], 4294967168 }
 0x1c5   :  { %214 = vsyncpa [#allocation4], 1 }

</bundles_post_ra>
